<compile_context>
chip_gen: v6e
topology: v6e:2x2x1
jax: 0.10.0
libtpu: 0.0.40
codegen_flags: <defaults>
</compile_context>

<pallas_src>
import jax
import jax.numpy as jnp
from jax.experimental import pallas as pl
from jax.experimental.pallas import tpu as pltpu


def _round_up(x, m):
    return (x + m - 1) // m * m


def _linear_kernel(x_ref, w_ref, b_ref, o_ref, acc_ref):
    # x_ref:   (tm, tk) bf16
    # w_ref:   (tn, tk) bf16   (PyTorch (out, in) layout -- contract over dim 1)
    # b_ref:   (1,  tn) f32
    # o_ref:   (tm, tn) f32
    # acc_ref: (tm, tn) f32 VMEM scratch, persists across the K grid axis
    k = pl.program_id(2)

    @pl.when(k == 0)
    def _():
        acc_ref[...] = jnp.zeros_like(acc_ref)

    acc_ref[...] += jax.lax.dot_general(
        x_ref[...],
        w_ref[...],
        dimension_numbers=(((1,), (1,)), ((), ())),
        preferred_element_type=jnp.float32,
    )

    @pl.when(k == pl.num_programs(2) - 1)
    def _():
        o_ref[...] = (acc_ref[...] + b_ref[...]).astype(o_ref.dtype)


def fc_forward(x, weight, bias, *, tm=256, tn=256, tk=512):
    """Equivalent of torch.nn.Linear(in_size, out_size)(x).

    x:      (batch, in_size)    float32
    weight: (out_size, in_size) float32 (PyTorch convention, NOT transposed)
    bias:   (out_size,)         float32
    returns (batch, out_size)   float32
    """
    M, K = x.shape
    N, Kw = weight.shape
    assert K == Kw

    # Clamp tiles to the (128-aligned) problem size, keep MXU/lane alignment.
    tm = min(tm, _round_up(M, 128))
    tn = min(tn, _round_up(N, 128))
    tk = min(tk, _round_up(K, 128))
    Mp, Np, Kp = _round_up(M, tm), _round_up(N, tn), _round_up(K, tk)

    # Zero-pad to exact tile multiples (lane-dense output, no ragged blocks)
    # and cast MXU operands to bf16; bias stays f32 for the epilogue add.
    xp = jnp.zeros((Mp, Kp), jnp.bfloat16).at[:M, :K].set(x.astype(jnp.bfloat16))
    wp = jnp.zeros((Np, Kp), jnp.bfloat16).at[:N, :K].set(
        weight.astype(jnp.bfloat16)
    )
    bp = jnp.zeros((1, Np), jnp.float32).at[0, :N].set(bias.astype(jnp.float32))

    grid = (Mp // tm, Np // tn, Kp // tk)

    out_padded = pl.pallas_call(
        _linear_kernel,
        out_shape=jax.ShapeDtypeStruct((Mp, Np), jnp.float32),
        grid_spec=pltpu.PrefetchScalarGridSpec(
            num_scalar_prefetch=0,
            grid=grid,
            in_specs=[
                pl.BlockSpec((tm, tk), lambda i, j, k: (i, k)),  # x
                pl.BlockSpec((tn, tk), lambda i, j, k: (j, k)),  # weight (N, K)
                pl.BlockSpec((1, tn), lambda i, j, k: (0, j)),   # bias
            ],
            out_specs=pl.BlockSpec((tm, tn), lambda i, j, k: (i, j)),
            scratch_shapes=[pltpu.VMEM((tm, tn), jnp.float32)],
        ),
        compiler_params=pltpu.CompilerParams(
            dimension_semantics=("parallel", "parallel", "arbitrary"),
        ),
    )(xp, wp, bp)

    return out_padded[:M, :N]


if __name__ == "__main__":
    key = jax.random.PRNGKey(0)
    k_x, k_w, k_b = jax.random.split(key, 3)

    batch, in_size, out_size = 8, 32, 16

    x = jax.random.normal(k_x, (batch, in_size), dtype=jnp.float32)
    # PyTorch-style Linear init (uniform with bound 1/sqrt(in_size)).
    bound = 1.0 / jnp.sqrt(jnp.float32(in_size))
    weight = jax.random.uniform(
        k_w, (out_size, in_size), minval=-bound, maxval=bound, dtype=jnp.float32
    )
    bias = jax.random.uniform(
        k_b, (out_size,), minval=-bound, maxval=bound, dtype=jnp.float32
    )

    out = fc_forward(x, weight, bias)
    out = jax.block_until_ready(out)

    # Reference checks (bf16 MXU operands -> loosened tolerance vs pure f32).
    ref_f32 = x @ weight.T + bias
    ref_bf16 = (
        x.astype(jnp.bfloat16).astype(jnp.float32)
        @ weight.astype(jnp.bfloat16).astype(jnp.float32).T
        + bias
    )
    assert out.shape == (batch, out_size)
    assert jnp.allclose(out, ref_bf16, atol=1e-3, rtol=1e-3)
    assert jnp.allclose(out, ref_f32, atol=2e-2, rtol=2e-2)

    print("KERNEL_OK")
</pallas_src>

<mosaic_0001>
module attributes {stable_mosaic.version = 11 : i64} {
  func.func @_linear_kernel(%arg0: i32, %arg1: i32, %arg2: i32, %arg3: memref<128x128xbf16, #tpu.memory_space<vmem>>, %arg4: memref<128x128xbf16, #tpu.memory_space<vmem>>, %arg5: memref<1x128xf32, #tpu.memory_space<vmem>>, %arg6: memref<128x128xf32, #tpu.memory_space<vmem>>, %arg7: memref<128x128xf32, #tpu.memory_space<vmem>>) attributes {dimension_semantics = [#tpu.dimension_semantics<parallel>, #tpu.dimension_semantics<parallel>, #tpu.dimension_semantics<arbitrary>], iteration_bounds = array<i64: 1, 1, 1>, scalar_prefetch = 0 : i64, scratch_operands = 1 : i64, tpu.core_type = #tpu.core_type<tc>, window_params = [{transform_indices = @transform_0, window_bounds = array<i64: 128, 128>}, {transform_indices = @transform_1, window_bounds = array<i64: 128, 128>}, {transform_indices = @transform_2, window_bounds = array<i64: 1, 128>}, {transform_indices = @transform_3, window_bounds = array<i64: 128, 128>}]} {
    %c0_i32 = arith.constant 0 : i32
    %0 = arith.cmpi eq, %arg2, %c0_i32 : i32
    %1 = arith.extui %0 : i1 to i32
    %c0_i32_0 = arith.constant 0 : i32
    %2 = arith.cmpi ne, %1, %c0_i32_0 : i32
    scf.if %2 {
      %cst_10 = arith.constant 0.000000e+00 : f32
      %12 = vector.broadcast %cst_10 : f32 to vector<128x128xf32>
      %c0_11 = arith.constant 0 : index
      %c0_12 = arith.constant 0 : index
      %13 = vector.load %arg7[%c0_11, %c0_12] : memref<128x128xf32, #tpu.memory_space<vmem>>, vector<128x128xf32>
      tpu.vector_store %arg7[%c0_11, %c0_12], %12 {strides = array<i32>} : memref<128x128xf32, #tpu.memory_space<vmem>>, vector<128x128xf32>,
    } else {
    }
    %c0 = arith.constant 0 : index
    %c0_1 = arith.constant 0 : index
    %3 = vector.load %arg7[%c0, %c0_1] : memref<128x128xf32, #tpu.memory_space<vmem>>, vector<128x128xf32>
    %c0_2 = arith.constant 0 : index
    %c0_3 = arith.constant 0 : index
    %4 = vector.load %arg3[%c0_2, %c0_3] : memref<128x128xbf16, #tpu.memory_space<vmem>>, vector<128x128xbf16>
    %c0_4 = arith.constant 0 : index
    %c0_5 = arith.constant 0 : index
    %5 = vector.load %arg4[%c0_4, %c0_5] : memref<128x128xbf16, #tpu.memory_space<vmem>>, vector<128x128xbf16>
    %cst = arith.constant dense<0.000000e+00> : vector<128x128xf32>
    %6 = tpu.matmul %4, %5, %cst {dimension_numbers = #tpu.dot_dimension_numbers<[1], [1], [0], [0], [0, 0, 1, 0], [], []>} : vector<128x128xbf16>, vector<128x128xbf16>, vector<128x128xf32> -> vector<128x128xf32>
    %7 = arith.addf %3, %6 : vector<128x128xf32>
    %c0_6 = arith.constant 0 : index
    %c0_7 = arith.constant 0 : index
    %8 = vector.load %arg7[%c0_6, %c0_7] : memref<128x128xf32, #tpu.memory_space<vmem>>, vector<128x128xf32>
    tpu.vector_store %arg7[%c0_6, %c0_7], %7 {strides = array<i32>} : memref<128x128xf32, #tpu.memory_space<vmem>>, vector<128x128xf32>,
    %c0_i32_8 = arith.constant 0 : i32
    %9 = arith.cmpi eq, %arg2, %c0_i32_8 : i32
    %10 = arith.extui %9 : i1 to i32
    %c0_i32_9 = arith.constant 0 : i32
    %11 = arith.cmpi ne, %10, %c0_i32_9 : i32
    scf.if %11 {
      %c0_10 = arith.constant 0 : index
      %c0_11 = arith.constant 0 : index
      %12 = vector.load %arg7[%c0_10, %c0_11] : memref<128x128xf32, #tpu.memory_space<vmem>>, vector<128x128xf32>
      %c0_12 = arith.constant 0 : index
      %c0_13 = arith.constant 0 : index
      %13 = vector.load %arg5[%c0_12, %c0_13] : memref<1x128xf32, #tpu.memory_space<vmem>>, vector<1x128xf32>
      %14 = vector.broadcast %13 : vector<1x128xf32> to vector<128x128xf32>
      %15 = arith.addf %12, %14 : vector<128x128xf32>
      %c0_14 = arith.constant 0 : index
      %c0_15 = arith.constant 0 : index
      %16 = vector.load %arg6[%c0_14, %c0_15] : memref<128x128xf32, #tpu.memory_space<vmem>>, vector<128x128xf32>
      tpu.vector_store %arg6[%c0_14, %c0_15], %15 {strides = array<i32>} : memref<128x128xf32, #tpu.memory_space<vmem>>, vector<128x128xf32>,
    } else {
    }
    return
  }
  func.func @transform_0(%arg0: i32, %arg1: i32, %arg2: i32) -> (i32, i32) {
    %c0_i32 = arith.constant 0 : i32
    return %arg0, %arg2 : i32, i32
  }
  func.func @transform_1(%arg0: i32, %arg1: i32, %arg2: i32) -> (i32, i32) {
    %c0_i32 = arith.constant 0 : i32
    return %arg1, %arg2 : i32, i32
  }
  func.func @transform_2(%arg0: i32, %arg1: i32, %arg2: i32) -> (i32, i32) {
    %c0_i32 = arith.constant 0 : i32
    %c0_i32_0 = arith.constant 0 : i32
    return %c0_i32, %arg1 : i32, i32
  }
  func.func @transform_3(%arg0: i32, %arg1: i32, %arg2: i32) -> (i32, i32) {
    %c0_i32 = arith.constant 0 : i32
    return %arg0, %arg1 : i32, i32
  }
}

</mosaic_0001>

<bundles_post_ra>
// kernel: tpu_custom_call.1
= control target key start
LH: loop header
LB: loop body
LE: loop exit
PB: predicated region body
PF: predicated region fallthrough
CT: control target
= control target key end

     0   :  { %8 = vsyncpa [#allocation4], 0  ;;  %s622_s0 = inlined_call_operand.hbm [shape: bf16[128,128], index: 0, kind: input, shape index: {}]   ;;  %s623_s1 = inlined_call_operand.hbm [shape: bf16[128,128], index: 1, kind: input, shape index: {}]   ;;  %s624_s2 = inlined_call_operand.vmem [shape: f32[1,128], index: 2, kind: input, shape index: {}]   ;;  %s625_s3 = inlined_call_operand.hbm [shape: f32[128,128], index: 3, kind: output, shape index: {}]  }
   0x1   :  { %9 = vsyncpa [#allocation7], 0 }
   0x2   :  { %10 = vsyncpa [#allocation5], 0  ;;  %s583_s12 = smov [#allocation3]  }
   0x3   :  { %s16_s13 = sshll.u32 %s583_s12, 4  ;;  %s17_s13 = int_to_ptr.vmem [resolvable:$true] %s16_s13 }
   0x4   :  { %s525_s14 = scalar_lea.vmem %s17_s13, 1024  ;;  %p530_p1 = scmp.lt.s32.totalorder %s17_s13, %s17_s13 }
   0x5   :  { %p526_p0 = scmp.ne.s32.totalorder %s17_s13, %s525_s14  ;;  %p531_p2 = scmp.lt.s32.totalorder %s525_s14, %s525_s14 }
   0x7   :  { %p532_p3 = por %p531_p2, %p530_p1 }
   0x9   :  { %p533_p4 = pnand %p532_p3, %p526_p0 }
   0xb   :  { %536 = shalt.err (!%p533_p4)
}
   0xc   :  { %s584_s15 = smov 64   ;;  %s585_s16 = smov 4  }
   0xd   :  { %22 = dma.hbm_to_vmem [thread:$0]  %s622_s0, 1024, %s17_s13, [#allocation4], %s584_s15, %s584_s15, %s585_s16  }
   0xe   :  { %s586_s19 = smov [#allocation6]  }
   0xf   :  { %s28_s20 = sshll.u32 %s586_s19, 4  ;;  %s29_s20 = int_to_ptr.vmem [resolvable:$true] %s28_s20 }
  0x10   :  { %s545_s21 = scalar_lea.vmem %s29_s20, 1024  ;;  %p550_p6 = scmp.lt.s32.totalorder %s29_s20, %s29_s20 }
  0x11   :  { %p546_p5 = scmp.ne.s32.totalorder %s29_s20, %s545_s21  ;;  %p551_p7 = scmp.lt.s32.totalorder %s545_s21, %s545_s21 }
  0x13   :  { %p552_p8 = por %p551_p7, %p550_p6 }
  0x15   :  { %p553_p9 = pnand %p552_p8, %p546_p5 }
  0x17   :  { %556 = shalt.err (!%p553_p9)
}
  0x18   :  { %34 = dma.hbm_to_vmem [thread:$0]  %s623_s1, 1024, %s29_s20, [#allocation7], %s584_s15, %s584_s15, %s585_s16  }
  0x19   :  { %577 = dma.done.wait [#allocation4], 1024  }
  0x1a   :  { %578 = vsyncadd [#allocation4], 4294966272 }
  0x1b   :  { %579 = dma.done.wait [#allocation7], 1024  }
  0x1c   :  { %580 = vsyncadd [#allocation7], 4294966272  ;;  %v501_v0 = vld [vmem:[#allocation6 + $0x38] sm:$0xff]   ;;  %v502_v1 = vld [vmem:[#allocation6 + $0x30] sm:$0xff]  }
  0x1d   :  { %446 = vmatprep.subr.bf16.mxu0 %v501_v0  ;;  %478 = vmatprep.subr.bf16.mxu1 %v501_v0  ;;  %v503_v2 = vld [vmem:[#allocation6 + $0x28] sm:$0xff]   ;;  %v509_v3 = vld [vmem:[#allocation3] sm:$0xff]   ;;  %v505_v6 = vld [vmem:[#allocation6 + $0x18] sm:$0xff]  }
  0x1e   :  { %447 = vmatpush3.bf16.xpose.msra.mxu0 %v501_v0  ;;  %486 = vmatpush3.bf16.xpose.msra.mxu1 %v501_v0  ;;  %v510_v4 = vld [vmem:[#allocation3 + $0x20] sm:$0xff]   ;;  %v506_v7 = vld [vmem:[#allocation6 + $0x10] sm:$0xff]   ;;  %v507_v8 = vld [vmem:[#allocation6 + $0x8] sm:$0xff]  }
  0x1f   :  { %448 = vmatprep.subr.bf16.mxu0 %v502_v1  ;;  %479 = vmatprep.subr.bf16.mxu1 %v502_v1  ;;  %v504_v5 = vld [vmem:[#allocation6 + $0x20] sm:$0xff]   ;;  %v511_v10 = vld [vmem:[#allocation3 + $0x8] sm:$0xff]   ;;  %v513_v12 = vld [vmem:[#allocation3 + $0x10] sm:$0xff]  }
  0x20   :  { %462 = vmatprep.mubr.bf16.mxu0 %v509_v3  ;;  %470 = vmatprep.mubr.bf16.mxu1 %v510_v4  ;;  %v508_v9 = vld [vmem:[#allocation6] sm:$0xff]   ;;  %v512_v11 = vld [vmem:[#allocation3 + $0x28] sm:$0xff]   ;;  %v514_v13 = vld [vmem:[#allocation3 + $0x30] sm:$0xff]  }
  0x21   :  { %v515_v14 = vld [vmem:[#allocation3 + $0x18] sm:$0xff]   ;;  %v429_v16 = vld [vmem:[%s624_s2] ss:$0 sm:$0xff]  ;;  %s587_s2 = smov [#allocation8]  }
  0x22   :  { %v516_v15 = vld [vmem:[#allocation3 + $0x38] sm:$0xff]   ;;  %s400_s24 = sshll.u32 %s587_s2, 4  ;;  %s401_s24 = int_to_ptr.vmem [resolvable:$true] %s400_s24 }
  0x23   :  { %s557_s25 = scalar_lea.vmem %s401_s24, 2048  ;;  %p562_p11 = scmp.lt.s32.totalorder %s401_s24, %s401_s24 }
  0x24   :  { %p558_p10 = scmp.ne.s32.totalorder %s401_s24, %s557_s25  ;;  %p563_p12 = scmp.lt.s32.totalorder %s557_s25, %s557_s25 }
  0x26   :  { %449 = vmatpush3.bf16.xpose.msra.mxu0 %v502_v1  ;;  %487 = vmatpush3.bf16.xpose.msra.mxu1 %v502_v1  ;;  %p564_p13 = por %p563_p12, %p562_p11 }
  0x27   :  { %450 = vmatprep.subr.bf16.mxu0 %v503_v2  ;;  %480 = vmatprep.subr.bf16.mxu1 %v503_v2 }
  0x28   :  { %p565_p0 = pnand %p564_p13, %p558_p10 }
  0x2e   :  { %451 = vmatpush3.bf16.xpose.msra.mxu0 %v503_v2  ;;  %488 = vmatpush3.bf16.xpose.msra.mxu1 %v503_v2 }
  0x2f   :  { %452 = vmatprep.subr.bf16.mxu0 %v504_v5  ;;  %481 = vmatprep.subr.bf16.mxu1 %v504_v5 }
  0x36   :  { %453 = vmatpush3.bf16.xpose.msra.mxu0 %v504_v5  ;;  %489 = vmatpush3.bf16.xpose.msra.mxu1 %v504_v5 }
  0x37   :  { %454 = vmatprep.subr.bf16.mxu0 %v505_v6  ;;  %482 = vmatprep.subr.bf16.mxu1 %v505_v6 }
  0x3e   :  { %455 = vmatpush3.bf16.xpose.msra.mxu0 %v505_v6  ;;  %490 = vmatpush3.bf16.xpose.msra.mxu1 %v505_v6 }
  0x3f   :  { %456 = vmatprep.subr.bf16.mxu0 %v506_v7  ;;  %483 = vmatprep.subr.bf16.mxu1 %v506_v7 }
  0x46   :  { %457 = vmatpush3.bf16.xpose.msra.mxu0 %v506_v7  ;;  %491 = vmatpush3.bf16.xpose.msra.mxu1 %v506_v7 }
  0x47   :  { %458 = vmatprep.subr.bf16.mxu0 %v507_v8  ;;  %484 = vmatprep.subr.bf16.mxu1 %v507_v8 }
  0x4e   :  { %459 = vmatpush3.bf16.xpose.msra.mxu0 %v507_v8  ;;  %492 = vmatpush3.bf16.xpose.msra.mxu1 %v507_v8 }
  0x4f   :  { %460 = vmatprep.subr.bf16.mxu0 %v508_v9  ;;  %485 = vmatprep.subr.bf16.mxu1 %v508_v9 }
  0x56   :  { %461 = vmatpush3.bf16.xpose.msra.mxu0 %v508_v9  ;;  %493 = vmatpush3.bf16.xpose.msra.mxu1 %v508_v9 }
  0x5d   :  { %463 = vmatmul.mubr.bf16.vlgmr.msra.gmra.mxu0 %v511_v10  ;;  %471 = vmatmul.mubr.bf16.vlgmr.msra.gmra.mxu1 %v512_v11 }
  0x5e   :  { %466 = vmatprep.mubr.bf16.mxu0 %v513_v12  ;;  %474 = vmatprep.mubr.bf16.mxu1 %v514_v13 }
  0x65   :  { %467 = vmatmul.mubr.bf16.gmra.mxu0 %v515_v14  ;;  %475 = vmatmul.mubr.bf16.gmra.mxu1 %v516_v15 }
 0x11d   :  { %v464_v17 = vpop.f32.mrf.mxu0  ;;  %v472_v18 = vpop.f32.mrf.mxu1 }
 0x11e   :  { %v365_v19 = vadd.f32 %v464_v17, %v429_v16  ;;  %v373_v20 = vadd.f32 %v472_v18, %v429_v16 }
 0x11f   :  { %v242_v21 = vpop.f32.mrf.mxu0  ;;  %v274_v22 = vpop.f32.mrf.mxu1 }
 0x120   :  { %381 = vst [vmem:[#allocation8 + $0x10] sm:$0xff] %v365_v19  ;;  %389 = vst [vmem:[#allocation8 + $0x50] sm:$0xff] %v373_v20  ;;  %v363_v23 = vadd.f32 %v429_v16, %v242_v21  ;;  %v371_v24 = vadd.f32 %v429_v16, %v274_v22 }
 0x121   :  { %v465_v25 = vpop.f32.mrf.mxu0  ;;  %v473_v26 = vpop.f32.mrf.mxu1 }
 0x122   :  { %379 = vst [vmem:[#allocation8] sm:$0xff] %v363_v23  ;;  %387 = vst [vmem:[#allocation8 + $0x40] sm:$0xff] %v371_v24  ;;  %v366_v27 = vadd.f32 %v465_v25, %v429_v16  ;;  %v374_v28 = vadd.f32 %v473_v26, %v429_v16 }
 0x123   :  { %v245_v29 = vpop.f32.mrf.mxu0  ;;  %v277_v30 = vpop.f32.mrf.mxu1 }
 0x124   :  { %382 = vst [vmem:[#allocation8 + $0x18] sm:$0xff] %v366_v27  ;;  %390 = vst [vmem:[#allocation8 + $0x58] sm:$0xff] %v374_v28  ;;  %v364_v31 = vadd.f32 %v429_v16, %v245_v29  ;;  %v372_v32 = vadd.f32 %v429_v16, %v277_v30 }
 0x125   :  { %v468_v33 = vpop.f32.mrf.mxu0  ;;  %v476_v34 = vpop.f32.mrf.mxu1 }
 0x126   :  { %380 = vst [vmem:[#allocation8 + $0x8] sm:$0xff] %v364_v31  ;;  %388 = vst [vmem:[#allocation8 + $0x48] sm:$0xff] %v372_v32  ;;  %v369_v35 = vadd.f32 %v468_v33, %v429_v16  ;;  %v377_v36 = vadd.f32 %v476_v34, %v429_v16 }
 0x127   :  { %v258_v37 = vpop.f32.mrf.mxu0  ;;  %v290_v38 = vpop.f32.mrf.mxu1 }
 0x128   :  { %385 = vst [vmem:[#allocation8 + $0x30] sm:$0xff] %v369_v35  ;;  %393 = vst [vmem:[#allocation8 + $0x70] sm:$0xff] %v377_v36  ;;  %v367_v39 = vadd.f32 %v429_v16, %v258_v37  ;;  %v375_v40 = vadd.f32 %v429_v16, %v290_v38 }
 0x129   :  { %v469_v41 = vpop.f32.mrf.mxu0  ;;  %v477_v42 = vpop.f32.mrf.mxu1 }
 0x12a   :  { %383 = vst [vmem:[#allocation8 + $0x20] sm:$0xff] %v367_v39  ;;  %391 = vst [vmem:[#allocation8 + $0x60] sm:$0xff] %v375_v40  ;;  %v370_v43 = vadd.f32 %v469_v41, %v429_v16  ;;  %v378_v44 = vadd.f32 %v477_v42, %v429_v16 }
 0x12b   :  { %v261_v45 = vpop.f32.mrf.mxu0  ;;  %v293_v46 = vpop.f32.mrf.mxu1 }
 0x12c   :  { %386 = vst [vmem:[#allocation8 + $0x38] sm:$0xff] %v370_v43  ;;  %394 = vst [vmem:[#allocation8 + $0x78] sm:$0xff] %v378_v44  ;;  %v368_v47 = vadd.f32 %v429_v16, %v261_v45  ;;  %v376_v48 = vadd.f32 %v429_v16, %v293_v46 }
 0x12e   :  { %384 = vst [vmem:[#allocation8 + $0x28] sm:$0xff] %v368_v47  ;;  %392 = vst [vmem:[#allocation8 + $0x68] sm:$0xff] %v376_v48 }
 0x12f   :  { %568 = shalt.err (!%p565_p0)
}
 0x130   :  { %s588_s26 = smov 128   ;;  %s589_s27 = smov 8  }
 0x131   :  { %406 = dma.vmem_to_hbm [thread:$0]  %s401_s24, 2048, %s625_s3, [#allocation5], %s588_s26, %s588_s26, %s589_s27  }
 0x132   :  { %581 = dma.done.wait [#allocation5], 2048  }
 0x133   :  { %582 = vsyncadd [#allocation5], 4294965248 }
 0x134   :  { %410 = vsyncpa [#allocation4], 1 }
 0x135   :  { %411 = vsyncpa [#allocation7], 1 }
 0x136   :  { %412 = vsyncpa [#allocation5], 1 }

</bundles_post_ra>
